<compile_context>
chip_gen: v7x
topology: tpu7x:2x2x1
jax: 0.10.0
libtpu: 0.0.40
codegen_flags: <defaults>
</compile_context>

<pallas_src>
import functools

import jax
import jax.numpy as jnp
from jax.experimental import pallas as pl
from jax.experimental.pallas import tpu as pltpu

_NEG_BIG = -1e30  # finite "-inf": every exp()/max() argument stays finite


def _drm_kernel(x_ref, w1_ref, b1_ref, w2_ref, b2_ref, t_ref, out_ref,
                m_scr, l_scr, mg_scr, il_scr, s_scr=None,
                *, n_valid, stash_scores):
    p = pl.program_id(0)          # 0 = score + accumulate group stats, 1 = normalize
    i = pl.program_id(1)          # tile index along N (rows -> 128-lane axis)
    tile_n = t_ref.shape[-1]

    t = t_ref[...]                                               # (1, TILE_N) i32
    lanes = jax.lax.broadcasted_iota(jnp.int32, (1, tile_n), 1)
    valid = (i * tile_n + lanes) < n_valid                       # (1, TILE_N) bool

    def compute_scores():
        # (H, D) x (TILE_N, D) contracted on D -> (H, TILE_N).  x keeps its
        # natural row-major layout; Mosaic folds the transpose into the MXU op.
        h = jnp.tanh(
            jax.lax.dot_general(
                w1_ref[...], x_ref[...],
                dimension_numbers=(((1,), (1,)), ((), ())),
                preferred_element_type=jnp.float32)
            + b1_ref[...])                                       # (H, TILE_N) f32
        # Second Linear (H -> 1) as VPU multiply + sublane reduce.
        s = jnp.sum(h * w2_ref[...], axis=0, keepdims=True) + b2_ref[0]
        # Mask padded / ragged-tail lanes to a finite "-inf" so downstream
        # exp() can never overflow (exp(_NEG_BIG - m) == 0).
        return jnp.where(valid, s, _NEG_BIG)                     # (1, TILE_N) f32

    @pl.when(jnp.logical_and(p == 0, i == 0))
    def _init():
        m_scr[...] = jnp.full_like(m_scr, _NEG_BIG)
        l_scr[...] = jnp.zeros_like(l_scr)

    @pl.when(p == 0)
    def _score_and_accumulate():
        s = compute_scores()
        if stash_scores:
            s_scr[pl.ds(i, 1), :] = s        # consumed by pass 1 (no recompute)
        group = jax.lax.broadcasted_iota(jnp.int32, (2, tile_n), 0)
        mask = valid & (t == group)                              # (2, TILE_N)
        # Per-lane online softmax partials (flash-style), one row per group.
        s_g = jnp.where(mask, s, _NEG_BIG)
        m_old = m_scr[...]
        m_new = jnp.maximum(m_old, s_g)
        l_scr[...] = (l_scr[...] * jnp.exp(m_old - m_new)
                      + jnp.where(mask, jnp.exp(s - m_new), 0.0))
        m_scr[...] = m_new

    @pl.when(jnp.logical_and(p == 1, i == 0))
    def _finalize_group_stats():
        # Hoisted out of the per-tile normalize loop: done exactly once.
        m_part = m_scr[...]                                      # (2, TILE_N)
        m_g = jnp.max(m_part, axis=-1, keepdims=True)            # (2, 1) group max
        l_g = jnp.sum(l_scr[...] * jnp.exp(m_part - m_g),
                      axis=-1, keepdims=True)                    # (2, 1) group sum
        mg_scr[...] = m_g
        il_scr[...] = 1.0 / l_g                                  # exact reciprocal

    @pl.when(p == 1)
    def _normalize():
        if stash_scores:
            s = s_scr[pl.ds(i, 1), :]
        else:
            s = compute_scores()             # fallback: stash didn't fit VMEM
        m_g = mg_scr[...]
        il_g = il_scr[...]
        is0 = t == 0
        m_sel = jnp.where(is0, m_g[0:1, :], m_g[1:2, :])         # (1, TILE_N)
        il_sel = jnp.where(is0, il_g[0:1, :], il_g[1:2, :])
        res = jnp.exp(s - m_sel) * il_sel    # == exp(s) / sum_{group} exp(s)
        out_ref[...] = jnp.where(valid, res, 0.0)


def direct_ranking_model(x, w1, b1, w2, b2, T, *, tile_n=None,
                         vmem_budget_bytes=20 << 20,
                         max_score_scratch_bytes=8 << 20):
    """x:(N,D), w1:(D,H), b1:(H,), w2:(H,1), b2:(1,), T:(N,) int -> (N,) f32."""
    N, D = x.shape
    H = w1.shape[1]
    itemsize = jnp.dtype(x.dtype).itemsize
    d_pad = -(-D // 128) * 128           # lane padding of a (tile_n, D) VMEM tile

    if tile_n is None:
        # VMEM-budget- and D-aware tile size (bytes resident in VMEM per row).
        per_row = 2 * d_pad * itemsize   # double-buffered x tile
        per_row += 2 * 4 + 2 * 4         # T (i32) + out (f32) double buffers
        per_row += 2 * 2 * 4             # m/l per-group online partials
        per_row += 4                     # stashed score
        tile_n = 128 * max(1, vmem_budget_bytes // (128 * per_row))
        tile_n = max(min(tile_n, 8192), 512)          # >=512 lanes for DMA eff.
        tile_n = min(tile_n, 128 * pl.cdiv(N, 128))   # don't exceed (padded) N
    assert tile_n % 128 == 0 and tile_n > 0
    num_tiles = pl.cdiv(N, tile_n)
    n_pad = num_tiles * tile_n

    # Stash pass-0 scores in VMEM when they fit; otherwise recompute in pass 1.
    s_rows = -(-num_tiles // 8) * 8                   # sublane-padded rows
    stash_scores = s_rows * tile_n * 4 <= max_score_scratch_bytes

    # x goes in untouched (no pad/transpose/cast HBM round trip).  Only the
    # tiny per-row metadata (T) and the output are padded to whole lane tiles.
    w1T = w1.T.astype(x.dtype)                         # (H, D), VMEM-resident
    b1c = b1.reshape(H, 1).astype(jnp.float32)
    w2c = w2.reshape(H, 1).astype(jnp.float32)
    b2s = b2.reshape(1).astype(jnp.float32)            # SMEM scalar
    t_pad = jnp.zeros((1, n_pad), jnp.int32).at[0, :N].set(T.astype(jnp.int32))

    if stash_scores:
        # Pass 1 reads scores from the VMEM stash; pin x's block index to the
        # tile already resident so pass 1 streams NO x from HBM at all.
        x_map = lambda p, i: (i * (1 - p) + p * (num_tiles - 1), 0)
    else:
        x_map = lambda p, i: (i, 0)                    # recompute: re-stream x

    scratch_shapes = [
        pltpu.VMEM((2, tile_n), jnp.float32),   # per-lane per-group max partials
        pltpu.VMEM((2, tile_n), jnp.float32),   # per-lane per-group sum partials
        pltpu.VMEM((2, 1), jnp.float32),        # global per-group max
        pltpu.VMEM((2, 1), jnp.float32),        # global per-group 1/sum(exp)
    ]
    if stash_scores:
        scratch_shapes.append(pltpu.VMEM((num_tiles, tile_n), jnp.float32))

    # Rough VMEM requirement with 2x headroom; keep well inside v7x's 64 MiB
    # physical VMEM while lifting v5e's 16 MiB default scope.
    est = (2 * tile_n * d_pad * itemsize              # x double buffer
           + 4 * 8 * tile_n * 4                       # T + out double buffers
           + 2 * 2 * tile_n * 4                       # m/l scratch
           + (s_rows * tile_n * 4 if stash_scores else 0)
           + 2 * (-(-H // 8) * 8) * d_pad * itemsize  # resident weights
           + (1 << 20))                               # misc headroom
    vmem_limit = int(min(max(2 * est, 32 << 20), 48 << 20))

    kernel = functools.partial(_drm_kernel, n_valid=N, stash_scores=stash_scores)

    out = pl.pallas_call(
        kernel,
        out_shape=jax.ShapeDtypeStruct((1, n_pad), jnp.float32),
        grid_spec=pltpu.PrefetchScalarGridSpec(
            num_scalar_prefetch=0,
            grid=(2, num_tiles),
            in_specs=[
                pl.BlockSpec((tile_n, D), x_map),                    # x row tile
                pl.BlockSpec((H, D), lambda p, i: (0, 0)),           # W1^T resident
                pl.BlockSpec((H, 1), lambda p, i: (0, 0)),           # b1 resident
                pl.BlockSpec((H, 1), lambda p, i: (0, 0)),           # w2 resident
                pl.BlockSpec(memory_space=pltpu.MemorySpace.SMEM),   # b2 scalar
                pl.BlockSpec((1, tile_n), lambda p, i: (0, i)),      # T tile
            ],
            # Only pass 1 writes real data.  The output block index is pinned
            # at 0 during pass 0, so it never changes there and no unwritten
            # VMEM buffer is ever written back to HBM; every output block's
            # LAST visitor is its pass-1 iteration, which writes it.
            out_specs=pl.BlockSpec((1, tile_n), lambda p, i: (0, p * i)),
            scratch_shapes=scratch_shapes,
        ),
        compiler_params=pltpu.CompilerParams(
            dimension_semantics=("arbitrary", "arbitrary"),
            vmem_limit_bytes=vmem_limit),
    )(x, w1T, b1c, w2c, b2s, t_pad)
    return out[0, :N]


def _reference(x, w1, b1, w2, b2, T):
    h = jnp.tanh(x @ w1 + b1)
    s = (h @ w2).reshape(-1) + b2[0]
    es = jnp.exp(s)
    sum0 = jnp.sum(jnp.where(T == 0, es, 0.0))
    sum1 = jnp.sum(jnp.where(T == 1, es, 0.0))
    return es / jnp.where(T == 0, sum0, sum1)


if __name__ == "__main__":
    N, input_dim, hidden_dim = 8, 16, 32
    key = jax.random.PRNGKey(0)
    kx, kw1, kb1, kw2, kb2, kt = jax.random.split(key, 6)

    x = jax.random.normal(kx, (N, input_dim), dtype=jnp.float32)
    w1 = jax.random.uniform(kw1, (input_dim, hidden_dim), jnp.float32, -0.25, 0.25)
    b1 = jax.random.uniform(kb1, (hidden_dim,), jnp.float32, -0.25, 0.25)
    w2 = jax.random.uniform(kw2, (hidden_dim, 1), jnp.float32, -0.2, 0.2)
    b2 = jax.random.uniform(kb2, (1,), jnp.float32, -0.2, 0.2)
    T = jnp.array([0, 1, 0, 1, 0, 1, 0, 1], dtype=jnp.int32)

    ref = _reference(x, w1, b1, w2, b2, T)

    # f32 streaming path: tight match against the f32 PyTorch-module semantics.
    out = jax.block_until_ready(direct_ranking_model(x, w1, b1, w2, b2, T))
    assert out.shape == (N,)
    assert jnp.allclose(out, ref, atol=1e-5, rtol=1e-5), (out, ref)

    # Caller-provided bf16 x (halved x HBM stream on v6e/v7x): looser tolerance.
    out_bf16 = jax.block_until_ready(
        direct_ranking_model(x.astype(jnp.bfloat16), w1, b1, w2, b2, T))
    assert out_bf16.shape == (N,)
    assert jnp.allclose(out_bf16, ref, atol=2e-2, rtol=2e-2), (out_bf16, ref)

    # Multi-tile grid + ragged tail (N % tile_n != 0), VMEM score-stash path.
    N2 = 300
    kx2, kt2 = jax.random.split(kt)
    x2 = jax.random.normal(kx2, (N2, input_dim), dtype=jnp.float32)
    T2 = jax.random.randint(kt2, (N2,), 0, 2, dtype=jnp.int32)
    ref2 = _reference(x2, w1, b1, w2, b2, T2)
    out2 = jax.block_until_ready(
        direct_ranking_model(x2, w1, b1, w2, b2, T2, tile_n=128))
    assert out2.shape == (N2,)
    assert jnp.allclose(out2, ref2, atol=1e-5, rtol=1e-5), (out2, ref2)

    # Same shapes through the recompute fallback (score stash disabled).
    out3 = jax.block_until_ready(
        direct_ranking_model(x2, w1, b1, w2, b2, T2, tile_n=128,
                             max_score_scratch_bytes=0))
    assert jnp.allclose(out3, ref2, atol=1e-5, rtol=1e-5), (out3, ref2)

    print("KERNEL_OK")
</pallas_src>

<mosaic_0001>
module attributes {stable_mosaic.version = 11 : i64} {
  func.func @_drm_kernel(%arg0: i32, %arg1: i32, %arg2: memref<128x16xf32, #tpu.memory_space<vmem>>, %arg3: memref<32x16xf32, #tpu.memory_space<vmem>>, %arg4: memref<32x1xf32, #tpu.memory_space<vmem>>, %arg5: memref<32x1xf32, #tpu.memory_space<vmem>>, %arg6: memref<1xf32, #tpu.memory_space<smem>>, %arg7: memref<1x128xi32, #tpu.memory_space<vmem>>, %arg8: memref<1x128xf32, #tpu.memory_space<vmem>>, %arg9: memref<2x128xf32, #tpu.memory_space<vmem>>, %arg10: memref<2x128xf32, #tpu.memory_space<vmem>>, %arg11: memref<2x1xf32, #tpu.memory_space<vmem>>, %arg12: memref<2x1xf32, #tpu.memory_space<vmem>>, %arg13: memref<1x128xf32, #tpu.memory_space<vmem>>) attributes {dimension_semantics = [#tpu.dimension_semantics<arbitrary>, #tpu.dimension_semantics<arbitrary>], iteration_bounds = array<i64: 2, 1>, scalar_prefetch = 0 : i64, scratch_operands = 5 : i64, tpu.core_type = #tpu.core_type<tc>, window_params = [{transform_indices = @transform_0, window_bounds = array<i64: 128, 16>}, {pipeline_mode = #tpu.pipeline_mode<synchronous>, transform_indices = @transform_1, window_bounds = array<i64: 32, 16>}, {pipeline_mode = #tpu.pipeline_mode<synchronous>, transform_indices = @transform_2, window_bounds = array<i64: 32, 1>}, {pipeline_mode = #tpu.pipeline_mode<synchronous>, transform_indices = @transform_3, window_bounds = array<i64: 32, 1>}, {transform_indices = @transform_4, window_bounds = array<i64: 1>}, {transform_indices = @transform_5, window_bounds = array<i64: 1, 128>}, {transform_indices = @transform_6, window_bounds = array<i64: 1, 128>}]} {
    %c0 = arith.constant 0 : index
    %c0_0 = arith.constant 0 : index
    %0 = vector.load %arg7[%c0, %c0_0] : memref<1x128xi32, #tpu.memory_space<vmem>>, vector<1x128xi32>
    %1 = tpu.iota {dimensions = array<i32: 1>} : vector<1x128xi32>
    %c128_i32 = arith.constant 128 : i32
    %2 = arith.muli %arg1, %c128_i32 : i32
    %3 = vector.broadcast %2 : i32 to vector<1x128xi32>
    %4 = arith.addi %3, %1 : vector<1x128xi32>
    %c8_i32 = arith.constant 8 : i32
    %5 = vector.broadcast %c8_i32 : i32 to vector<1x128xi32>
    %6 = arith.cmpi slt, %4, %5 : vector<1x128xi32>
    %c0_i32 = arith.constant 0 : i32
    %7 = arith.cmpi eq, %arg0, %c0_i32 : i32
    %c0_i32_1 = arith.constant 0 : i32
    %8 = arith.cmpi eq, %arg1, %c0_i32_1 : i32
    %9 = arith.andi %7, %8 : i1
    %10 = arith.extui %9 : i1 to i32
    %c0_i32_2 = arith.constant 0 : i32
    %11 = arith.cmpi ne, %10, %c0_i32_2 : i32
    scf.if %11 {
      %cst = arith.constant -1.000000e+30 : f32
      %23 = vector.broadcast %cst : f32 to vector<2x128xf32>
      %c0_9 = arith.constant 0 : index
      %c0_10 = arith.constant 0 : index
      %24 = vector.load %arg9[%c0_9, %c0_10] : memref<2x128xf32, #tpu.memory_space<vmem>>, vector<2x128xf32>
      tpu.vector_store %arg9[%c0_9, %c0_10], %23 {strides = array<i32>} : memref<2x128xf32, #tpu.memory_space<vmem>>, vector<2x128xf32>,
      %cst_11 = arith.constant 0.000000e+00 : f32
      %25 = vector.broadcast %cst_11 : f32 to vector<2x128xf32>
      %c0_12 = arith.constant 0 : index
      %c0_13 = arith.constant 0 : index
      %26 = vector.load %arg10[%c0_12, %c0_13] : memref<2x128xf32, #tpu.memory_space<vmem>>, vector<2x128xf32>
      tpu.vector_store %arg10[%c0_12, %c0_13], %25 {strides = array<i32>} : memref<2x128xf32, #tpu.memory_space<vmem>>, vector<2x128xf32>,
    } else {
    }
    %c0_i32_3 = arith.constant 0 : i32
    %12 = arith.cmpi eq, %arg0, %c0_i32_3 : i32
    %13 = arith.extui %12 : i1 to i32
    %c0_i32_4 = arith.constant 0 : i32
    %14 = arith.cmpi ne, %13, %c0_i32_4 : i32
    scf.if %14 {
      %c0_9 = arith.constant 0 : index
      %c0_10 = arith.constant 0 : index
      %23 = vector.load %arg3[%c0_9, %c0_10] : memref<32x16xf32, #tpu.memory_space<vmem>>, vector<32x16xf32>
      %c0_11 = arith.constant 0 : index
      %c0_12 = arith.constant 0 : index
      %24 = vector.load %arg2[%c0_11, %c0_12] : memref<128x16xf32, #tpu.memory_space<vmem>>, vector<128x16xf32>
      %cst = arith.constant dense<0.000000e+00> : vector<32x128xf32>
      %25 = tpu.matmul %23, %24, %cst {dimension_numbers = #tpu.dot_dimension_numbers<[1], [1], [0], [0], [0, 0, 1, 0], [], []>} : vector<32x16xf32>, vector<128x16xf32>, vector<32x128xf32> -> vector<32x128xf32>
      %c0_13 = arith.constant 0 : index
      %c0_14 = arith.constant 0 : index
      %26 = vector.load %arg4[%c0_13, %c0_14] : memref<32x1xf32, #tpu.memory_space<vmem>>, vector<32x1xf32>
      %27 = vector.broadcast %26 : vector<32x1xf32> to vector<32x128xf32>
      %28 = arith.addf %25, %27 : vector<32x128xf32>
      %29 = math.tanh %28 : vector<32x128xf32>
      %c0_15 = arith.constant 0 : index
      %c0_16 = arith.constant 0 : index
      %30 = vector.load %arg5[%c0_15, %c0_16] : memref<32x1xf32, #tpu.memory_space<vmem>>, vector<32x1xf32>
      %31 = vector.broadcast %30 : vector<32x1xf32> to vector<32x128xf32>
      %32 = arith.mulf %29, %31 : vector<32x128xf32>
      %cst_17 = arith.constant dense<0.000000e+00> : vector<128xf32>
      %33 = vector.multi_reduction <add>, %32, %cst_17 [0] : vector<32x128xf32> to vector<128xf32>
      %34 = vector.shape_cast %33 : vector<128xf32> to vector<1x128xf32>
      %c0_18 = arith.constant 0 : index
      %35 = memref.load %arg6[%c0_18] : memref<1xf32, #tpu.memory_space<smem>>
      %36 = vector.broadcast %35 : f32 to vector<1x128xf32>
      %37 = arith.addf %34, %36 : vector<1x128xf32>
      %cst_19 = arith.constant -1.000000e+30 : f32
      %38 = vector.broadcast %cst_19 : f32 to vector<1x128xf32>
      %39 = arith.select %6, %37, %38 : vector<1x128xi1>, vector<1x128xf32>
      %40 = arith.index_cast %arg1 : i32 to index
      %c0_20 = arith.constant 0 : index
      %41 = vector.load %arg13[%40, %c0_20] : memref<1x128xf32, #tpu.memory_space<vmem>>, vector<1x128xf32>
      tpu.vector_store %arg13[%40, %c0_20], %39 {strides = array<i32>} : memref<1x128xf32, #tpu.memory_space<vmem>>, vector<1x128xf32>,
      %42 = tpu.iota {dimensions = array<i32: 0>} : vector<2x128xi32>
      %43 = vector.broadcast %0 : vector<1x128xi32> to vector<2x128xi32>
      %44 = arith.cmpi eq, %43, %42 : vector<2x128xi32>
      %45 = vector.broadcast %6 : vector<1x128xi1> to vector<2x128xi1>
      %46 = arith.andi %45, %44 : vector<2x128xi1>
      %cst_21 = arith.constant -1.000000e+30 : f32
      %47 = vector.shape_cast %39 : vector<1x128xf32> to vector<1x128xf32>
      %48 = vector.broadcast %47 : vector<1x128xf32> to vector<2x128xf32>
      %49 = vector.broadcast %cst_21 : f32 to vector<2x128xf32>
      %50 = arith.select %46, %48, %49 : vector<2x128xi1>, vector<2x128xf32>
      %c0_22 = arith.constant 0 : index
      %c0_23 = arith.constant 0 : index
      %51 = vector.load %arg9[%c0_22, %c0_23] : memref<2x128xf32, #tpu.memory_space<vmem>>, vector<2x128xf32>
      %52 = arith.maximumf %51, %50 : vector<2x128xf32>
      %c0_24 = arith.constant 0 : index
      %c0_25 = arith.constant 0 : index
      %53 = vector.load %arg10[%c0_24, %c0_25] : memref<2x128xf32, #tpu.memory_space<vmem>>, vector<2x128xf32>
      %54 = arith.subf %51, %52 : vector<2x128xf32>
      %55 = math.exp %54 : vector<2x128xf32>
      %56 = arith.mulf %53, %55 : vector<2x128xf32>
      %57 = vector.broadcast %39 : vector<1x128xf32> to vector<2x128xf32>
      %58 = arith.subf %57, %52 : vector<2x128xf32>
      %59 = math.exp %58 : vector<2x128xf32>
      %cst_26 = arith.constant 0.000000e+00 : f32
      %60 = vector.broadcast %cst_26 : f32 to vector<2x128xf32>
      %61 = arith.select %46, %59, %60 : vector<2x128xi1>, vector<2x128xf32>
      %62 = arith.addf %56, %61 : vector<2x128xf32>
      %c0_27 = arith.constant 0 : index
      %c0_28 = arith.constant 0 : index
      %63 = vector.load %arg10[%c0_27, %c0_28] : memref<2x128xf32, #tpu.memory_space<vmem>>, vector<2x128xf32>
      tpu.vector_store %arg10[%c0_27, %c0_28], %62 {strides = array<i32>} : memref<2x128xf32, #tpu.memory_space<vmem>>, vector<2x128xf32>,
      %c0_29 = arith.constant 0 : index
      %c0_30 = arith.constant 0 : index
      %64 = vector.load %arg9[%c0_29, %c0_30] : memref<2x128xf32, #tpu.memory_space<vmem>>, vector<2x128xf32>
      tpu.vector_store %arg9[%c0_29, %c0_30], %52 {strides = array<i32>} : memref<2x128xf32, #tpu.memory_space<vmem>>, vector<2x128xf32>,
    } else {
    }
    %c1_i32 = arith.constant 1 : i32
    %15 = arith.cmpi eq, %arg0, %c1_i32 : i32
    %c0_i32_5 = arith.constant 0 : i32
    %16 = arith.cmpi eq, %arg1, %c0_i32_5 : i32
    %17 = arith.andi %15, %16 : i1
    %18 = arith.extui %17 : i1 to i32
    %c0_i32_6 = arith.constant 0 : i32
    %19 = arith.cmpi ne, %18, %c0_i32_6 : i32
    scf.if %19 {
      %c0_9 = arith.constant 0 : index
      %c0_10 = arith.constant 0 : index
      %23 = vector.load %arg9[%c0_9, %c0_10] : memref<2x128xf32, #tpu.memory_space<vmem>>, vector<2x128xf32>
      %cst = arith.constant dense<0xFF800000> : vector<2xf32>
      %24 = vector.multi_reduction <maximumf>, %23, %cst [1] : vector<2x128xf32> to vector<2xf32>
      %25 = vector.shape_cast %24 : vector<2xf32> to vector<2x1xf32>
      %c0_11 = arith.constant 0 : index
      %c0_12 = arith.constant 0 : index
      %26 = vector.load %arg10[%c0_11, %c0_12] : memref<2x128xf32, #tpu.memory_space<vmem>>, vector<2x128xf32>
      %27 = vector.broadcast %25 : vector<2x1xf32> to vector<2x128xf32>
      %28 = arith.subf %23, %27 : vector<2x128xf32>
      %29 = math.exp %28 : vector<2x128xf32>
      %30 = arith.mulf %26, %29 : vector<2x128xf32>
      %cst_13 = arith.constant dense<0.000000e+00> : vector<2xf32>
      %31 = vector.multi_reduction <add>, %30, %cst_13 [1] : vector<2x128xf32> to vector<2xf32>
      %32 = vector.shape_cast %31 : vector<2xf32> to vector<2x1xf32>
      %c0_14 = arith.constant 0 : index
      %c0_15 = arith.constant 0 : index
      %33 = vector.load %arg11[%c0_14, %c0_15] : memref<2x1xf32, #tpu.memory_space<vmem>>, vector<2x1xf32>
      tpu.vector_store %arg11[%c0_14, %c0_15], %25 {strides = array<i32>} : memref<2x1xf32, #tpu.memory_space<vmem>>, vector<2x1xf32>,
      %cst_16 = arith.constant 1.000000e+00 : f32
      %34 = vector.broadcast %cst_16 : f32 to vector<2x1xf32>
      %35 = arith.divf %34, %32 : vector<2x1xf32>
      %c0_17 = arith.constant 0 : index
      %c0_18 = arith.constant 0 : index
      %36 = vector.load %arg12[%c0_17, %c0_18] : memref<2x1xf32, #tpu.memory_space<vmem>>, vector<2x1xf32>
      tpu.vector_store %arg12[%c0_17, %c0_18], %35 {strides = array<i32>} : memref<2x1xf32, #tpu.memory_space<vmem>>, vector<2x1xf32>,
    } else {
    }
    %c1_i32_7 = arith.constant 1 : i32
    %20 = arith.cmpi eq, %arg0, %c1_i32_7 : i32
    %21 = arith.extui %20 : i1 to i32
    %c0_i32_8 = arith.constant 0 : i32
    %22 = arith.cmpi ne, %21, %c0_i32_8 : i32
    scf.if %22 {
      %23 = arith.index_cast %arg1 : i32 to index
      %c0_9 = arith.constant 0 : index
      %24 = vector.load %arg13[%23, %c0_9] : memref<1x128xf32, #tpu.memory_space<vmem>>, vector<1x128xf32>
      %c0_10 = arith.constant 0 : index
      %c0_11 = arith.constant 0 : index
      %25 = vector.load %arg11[%c0_10, %c0_11] : memref<2x1xf32, #tpu.memory_space<vmem>>, vector<2x1xf32>
      %c0_12 = arith.constant 0 : index
      %c0_13 = arith.constant 0 : index
      %26 = vector.load %arg12[%c0_12, %c0_13] : memref<2x1xf32, #tpu.memory_space<vmem>>, vector<2x1xf32>
      %c0_i32_14 = arith.constant 0 : i32
      %27 = vector.broadcast %c0_i32_14 : i32 to vector<1x128xi32>
      %28 = arith.cmpi eq, %0, %27 : vector<1x128xi32>
      %29 = vector.extract_strided_slice %25 {offsets = [0, 0], sizes = [1, 1], strides = [1, 1]} : vector<2x1xf32> to vector<1x1xf32>
      %30 = vector.extract_strided_slice %25 {offsets = [1, 0], sizes = [1, 1], strides = [1, 1]} : vector<2x1xf32> to vector<1x1xf32>
      %31 = vector.shape_cast %29 : vector<1x1xf32> to vector<1x1xf32>
      %32 = vector.broadcast %31 : vector<1x1xf32> to vector<1x128xf32>
      %33 = vector.shape_cast %30 : vector<1x1xf32> to vector<1x1xf32>
      %34 = vector.broadcast %33 : vector<1x1xf32> to vector<1x128xf32>
      %35 = arith.select %28, %32, %34 : vector<1x128xi1>, vector<1x128xf32>
      %36 = vector.extract_strided_slice %26 {offsets = [0, 0], sizes = [1, 1], strides = [1, 1]} : vector<2x1xf32> to vector<1x1xf32>
      %37 = vector.extract_strided_slice %26 {offsets = [1, 0], sizes = [1, 1], strides = [1, 1]} : vector<2x1xf32> to vector<1x1xf32>
      %38 = vector.shape_cast %36 : vector<1x1xf32> to vector<1x1xf32>
      %39 = vector.broadcast %38 : vector<1x1xf32> to vector<1x128xf32>
      %40 = vector.shape_cast %37 : vector<1x1xf32> to vector<1x1xf32>
      %41 = vector.broadcast %40 : vector<1x1xf32> to vector<1x128xf32>
      %42 = arith.select %28, %39, %41 : vector<1x128xi1>, vector<1x128xf32>
      %43 = arith.subf %24, %35 : vector<1x128xf32>
      %44 = math.exp %43 : vector<1x128xf32>
      %45 = arith.mulf %44, %42 : vector<1x128xf32>
      %cst = arith.constant 0.000000e+00 : f32
      %46 = vector.broadcast %cst : f32 to vector<1x128xf32>
      %47 = arith.select %6, %45, %46 : vector<1x128xi1>, vector<1x128xf32>
      %c0_15 = arith.constant 0 : index
      %c0_16 = arith.constant 0 : index
      %48 = vector.load %arg8[%c0_15, %c0_16] : memref<1x128xf32, #tpu.memory_space<vmem>>, vector<1x128xf32>
      tpu.vector_store %arg8[%c0_15, %c0_16], %47 {strides = array<i32>} : memref<1x128xf32, #tpu.memory_space<vmem>>, vector<1x128xf32>,
    } else {
    }
    return
  }
  func.func @transform_0(%arg0: i32, %arg1: i32) -> (i32, i32) {
    %c1_i32 = arith.constant 1 : i32
    %0 = arith.subi %c1_i32, %arg0 : i32
    %1 = arith.muli %arg1, %0 : i32
    %c0_i32 = arith.constant 0 : i32
    %2 = arith.muli %arg0, %c0_i32 : i32
    %3 = arith.addi %1, %2 : i32
    %c0_i32_0 = arith.constant 0 : i32
    %c0_i32_1 = arith.constant 0 : i32
    return %3, %c0_i32_0 : i32, i32
  }
  func.func @transform_1(%arg0: i32, %arg1: i32) -> (i32, i32) {
    %c0_i32 = arith.constant 0 : i32
    %c0_i32_0 = arith.constant 0 : i32
    %c0_i32_1 = arith.constant 0 : i32
    return %c0_i32, %c0_i32_0 : i32, i32
  }
  func.func @transform_2(%arg0: i32, %arg1: i32) -> (i32, i32) {
    %c0_i32 = arith.constant 0 : i32
    %c0_i32_0 = arith.constant 0 : i32
    %c0_i32_1 = arith.constant 0 : i32
    return %c0_i32, %c0_i32_0 : i32, i32
  }
  func.func @transform_3(%arg0: i32, %arg1: i32) -> (i32, i32) {
    %c0_i32 = arith.constant 0 : i32
    %c0_i32_0 = arith.constant 0 : i32
    %c0_i32_1 = arith.constant 0 : i32
    return %c0_i32, %c0_i32_0 : i32, i32
  }
  func.func @transform_4(%arg0: i32, %arg1: i32) -> i32 {
    %c0_i32 = arith.constant 0 : i32
    %c0_i32_0 = arith.constant 0 : i32
    return %c0_i32 : i32
  }
  func.func @transform_5(%arg0: i32, %arg1: i32) -> (i32, i32) {
    %c0_i32 = arith.constant 0 : i32
    %c0_i32_0 = arith.constant 0 : i32
    return %c0_i32, %arg1 : i32, i32
  }
  func.func @transform_6(%arg0: i32, %arg1: i32) -> (i32, i32) {
    %0 = arith.muli %arg0, %arg1 : i32
    %c0_i32 = arith.constant 0 : i32
    %c0_i32_0 = arith.constant 0 : i32
    return %c0_i32, %0 : i32, i32
  }
}

</mosaic_0001>

<bundles_post_ra>
// kernel: tpu_custom_call.1
= control target key start
LH: loop header
LB: loop body
LE: loop exit
PB: predicated region body
PF: predicated region fallthrough
CT: control target
= control target key end

     0   :  { %s1299_s0 = inlined_call_operand.vmem [shape: f32[8,16], index: 0, kind: input, shape index: {}]   ;;  %s1300_s1 = inlined_call_operand.vmem [shape: f32[32,16], index: 1, kind: input, shape index: {}]   ;;  %s1301_s2 = inlined_call_operand.vmem [shape: f32[32,1], index: 2, kind: input, shape index: {}]   ;;  %s1302_s3 = inlined_call_operand.vmem [shape: f32[32,1], index: 3, kind: input, shape index: {}]   ;;  %s1303_s4 = inlined_call_operand.<no memory space> [shape: f32[1], index: 4, kind: input, shape index: {}]   ;;  %s1304_s5 = inlined_call_operand.vmem [shape: s32[1,128], index: 5, kind: input, shape index: {}]   ;;  %s1305_s6 = inlined_call_operand.hbm [shape: f32[1,128], index: 6, kind: output, shape index: {}]  }
   0x1   :  { %11 = sst [smem:[#allocation7]] %s1303_s4 }
   0x2   :  { %12 = vsyncpa [#allocation9], 0 }
   0x3   :  { %14 = vsyncpa [#allocation9 + $0x1], 0  ;;  %s1052_s23 = smov 0   ;;  %s1054_s24 = smov 0  }
   0x4   :  { %s1056_s25 = smov 0  }
   0x5 LB: > { %s735_s4 = sadd.s32 4294967295, %s1007_s25   ;;  %s736_s26 = sadd.s32 4294967294, %s1007_s25   ;;  %s1007_s25 = sphi %s1056_s25, %s20_s25   ;;  %s1003_s24 = sphi %s1054_s24, %s1312_s24   ;;  %s999_s23 = sphi %s1052_s23, %s1311_s23  }
   0x6   : > { %s32_s27 = sadd.s32 1, %s1003_s24  ;;  %p741_p0 = scmp.ge.s32.totalorder %s1007_s25, 1 }
   0x7   : > { %p34_p1 = scmp.ge.s32.totalorder %s32_s27, 2  ;;  %p251_p2 = scmp.lt.s32.totalorder %s1007_s25, 3 }
   0x9   : > { %s1314_s27 = smov (%p34_p1, %s32_s27), 0  ;;  %p252_p3 = pnand %p741_p0, %p251_p2 }
   0xa   : > { %v1077_v0 = vld [vmem:[%s1304_s5] sm:$0x1] (!%p252_p3)  ;;  %v306_v1 = vlaneseq (!%p252_p3)  ;;  %p312_p4 = scmp.eq.s32.totalorder (!%p252_p3), %s999_s23, 0 }
   0xb   : > { %255 = sbr.rel (%p252_p3) target bundleno = 858 (0x35a), region = 44 }
   0xc   : > { %v1081_v2 = vand.u32 (!%p252_p3), 127, %v306_v1 }
   0xe   : > { %vm311_vm0 = vcmp.lt.s32.totalorder (!%p252_p3), %v1081_v2, 8 }
  0x12   : > { %317 = sbr.rel (!%p312_p4) target bundleno = 25 (0x19), region = 48  ;;  %v1009_v3 = vmov (%p312_p4), -1e+30   ;;  %v1010_v4 = vmov (%p312_p4), 0.0  }
  0x13   : > { %318 = vst [vmem:[#allocation2] sm:$0x3] (%p312_p4), %v1009_v3  ;;  %319 = vst [vmem:[#allocation3] sm:$0x3] (%p312_p4), %v1010_v4 }
  0x19 PF: > { %p743_p5 = scmp.ne.s32.totalorder %s999_s23, 0 }
  0x1a   : > { %v327_v5 = vld [vmem:[%s1299_s0] sm:$0xff] (!%p743_p5)  ;;  %v328_v6 = vld [vmem:[%s1299_s0 + $0x8] sm:$0xff] (!%p743_p5)  ;;  %vm367_vm1 = vcmask (!%p743_p5), 130048   ;;  %v329_v7 = vld [vmem:[%s1299_s0 + $0x10] sm:$0xff] (!%p743_p5)  ;;  %v1011_v11 = vmov (!%p743_p5), 0   ;;  %s554_s29 = sld [smem:[#allocation7]] (!%p743_p5) }
  0x1b   : > { %322 = sbr.rel (%p743_p5) target bundleno = 365 (0x16d), region = 52  ;;  %v830_v8 = vpack.c.bf16 (!%p743_p5), %v328_v6, %v327_v5  ;;  %vm1096_vm2 = vmpackc.low (!%p743_p5), %vm367_vm1, %vm367_vm1  ;;  %v330_v10 = vld [vmem:[%s1299_s0 + $0x18] sm:$0xff] (!%p743_p5)  ;;  %934 = vset.pattern.permute.xlu0 (!%p743_p5), %v1011_v11  ;;  %935 = vset.pattern.permute.xlu1 (!%p743_p5), %v1011_v11  ;;  %v323_v13 = vld [vmem:[%s1300_s1] sm:$0xff] (!%p743_p5) }
  0x1c   : > { %v836_v12 = vpack.c.bf16 (!%p743_p5), %v330_v10, %v329_v7  ;;  %v331_v14 = vld [vmem:[%s1299_s0 + $0x20] sm:$0xff] (!%p743_p5)  ;;  %v332_v15 = vld [vmem:[%s1299_s0 + $0x28] sm:$0xff] (!%p743_p5)  ;;  %824 = vmatprep.mubr.msk.f32.mxu0 (!%p743_p5), %vm367_vm1, %v323_v13  ;;  %v325_v16 = vld [vmem:[%s1300_s1 + $0x10] sm:$0xff] (!%p743_p5) }
  0x1d   : > { %832 = vmatprep.subr.msk.bf16.mxu0 (!%p743_p5), %vm1096_vm2, %v830_v8  ;;  %878 = vmatprep.subr.msk.bf16.mxu1 (!%p743_p5), %vm1096_vm2, %v830_v8  ;;  %v343_v17 = vld [vmem:[%s1301_s2] sm:$0xff] (!%p743_p5)  ;;  %v345_v18 = vld [vmem:[%s1301_s2 + $0x10] sm:$0xff] (!%p743_p5)  ;;  %v842_v19 = vpack.c.bf16 (!%p743_p5), %v332_v15, %v331_v14  ;;  %v344_v20 = vld [vmem:[%s1301_s2 + $0x8] sm:$0xff] (!%p743_p5) }
  0x1e   : > { %835 = vmatpush3.bf16.xpose.msk.msra.mxu0 (!%p743_p5), %vm1096_vm2, %v830_v8  ;;  %886 = vmatpush3.bf16.xpose.msk.msra.mxu1 (!%p743_p5), %vm1096_vm2, %v830_v8  ;;  %v346_v21 = vld [vmem:[%s1301_s2 + $0x18] sm:$0xff] (!%p743_p5)  ;;  %v333_v22 = vld [vmem:[%s1299_s0 + $0x30] sm:$0xff] (!%p743_p5)  ;;  %v517_v24 = vld [vmem:[%s1302_s3] sm:$0xff] (!%p743_p5)  ;;  %v561_v8 = vshrl.u32 (!%p743_p5), %v306_v1, 7 }
  0x1f   : > { %838 = vmatprep.subr.msk.bf16.mxu0 (!%p743_p5), %vm1096_vm2, %v836_v12  ;;  %879 = vmatprep.subr.msk.bf16.mxu1 (!%p743_p5), %vm1096_vm2, %v836_v12  ;;  %v334_v23 = vld [vmem:[%s1299_s0 + $0x38] sm:$0xff] (!%p743_p5)  ;;  %v518_v25 = vld [vmem:[%s1302_s3 + $0x8] sm:$0xff] (!%p743_p5)  ;;  %v519_v27 = vld [vmem:[%s1302_s3 + $0x10] sm:$0xff] (!%p743_p5) }
  0x20   : > { %827 = vmatprep.mubr.msk.f32.mxu1 (!%p743_p5), %vm367_vm1, %v325_v16  ;;  %349 = vperm.xlu0 (!%p743_p5), %934, %v343_v17   ;;  %v848_v26 = vpack.c.bf16 (!%p743_p5), %v334_v23, %v333_v22  ;;  %v520_v28 = vld [vmem:[%s1302_s3 + $0x18] sm:$0xff] (!%p743_p5)  ;;  %v335_v29 = vld [vmem:[%s1299_s0 + $0x40] sm:$0xff] (!%p743_p5)  ;;  %v336_v30 = vld [vmem:[%s1299_s0 + $0x48] sm:$0xff] (!%p743_p5)  ;;  %v564_v11 = vsub.s32 (!%p743_p5), 0, %v561_v8  ;;  %v555_v17 = vstv (!%p743_p5), %s554_s29 }
  0x21   : > { %359 = vperm.xlu1 (!%p743_p5), %935, %v345_v18   ;;  %v854_v31 = vpack.c.bf16 (!%p743_p5), %v336_v30, %v335_v29  ;;  %v337_v32 = vld [vmem:[%s1299_s0 + $0x50] sm:$0xff] (!%p743_p5)  ;;  %v338_v33 = vld [vmem:[%s1299_s0 + $0x58] sm:$0xff] (!%p743_p5)  ;;  %v339_v35 = vld [vmem:[%s1299_s0 + $0x60] sm:$0xff] (!%p743_p5) }
  0x22   : > { %v860_v34 = vpack.c.bf16 %v338_v33, %v337_v32  ;;  %v340_v36 = vld [vmem:[%s1299_s0 + $0x68] sm:$0xff]  ;;  %v341_v38 = vld [vmem:[%s1299_s0 + $0x70] sm:$0xff]  ;;  %v342_v39 = vld [vmem:[%s1299_s0 + $0x78] sm:$0xff]  ;;  %v565_v14 = vrot.slane %v1077_v0, %v564_v11 }
  0x23   : > { %v866_v37 = vpack.c.bf16 %v340_v36, %v339_v35  ;;  %v872_v40 = vpack.c.bf16 %v342_v39, %v341_v38  ;;  %v324_v41 = vld [vmem:[%s1300_s1 + $0x8] sm:$0xff]  ;;  %v326_v42 = vld [vmem:[%s1300_s1 + $0x18] sm:$0xff]  ;;  %v573_v29 = vld [vmem:[#allocation3] sm:$0x3] }
  0x24   : > { %354 = vperm.xlu0 %934, %v344_v20   ;;  %vm566_vm3 = vcmp.eq.s32.totalorder %v565_v14, %v561_v8 }
  0x25   : > { %364 = vperm.xlu1 %935, %v346_v21   ;;  %vm1247_vm4 = vmand %vm311_vm0, %vm566_vm3  ;;  %v571_v21 = vld [vmem:[#allocation2] sm:$0x3] }
  0x26   : > { %841 = vmatpush3.bf16.xpose.msk.msra.mxu0 %vm1096_vm2, %v836_v12  ;;  %887 = vmatpush3.bf16.xpose.msk.msra.mxu1 %vm1096_vm2, %v836_v12 }
  0x27   : > { %844 = vmatprep.subr.msk.bf16.mxu0 %vm1096_vm2, %v842_v19  ;;  %880 = vmatprep.subr.msk.bf16.mxu1 %vm1096_vm2, %v842_v19 }
  0x28   : > { %523 = vperm.xlu0 %934, %v517_v24  }
  0x29   : > { %528 = vperm.xlu1 %935, %v518_v25  }
  0x2c   : > { %533 = vperm.xlu0 %934, %v519_v27  }
  0x2d   : > { %538 = vperm.xlu1 %935, %v520_v28  }
  0x2e   : > { %847 = vmatpush3.bf16.xpose.msk.msra.mxu0 %vm1096_vm2, %v842_v19  ;;  %888 = vmatpush3.bf16.xpose.msk.msra.mxu1 %vm1096_vm2, %v842_v19 }
  0x2f   : > { %850 = vmatprep.subr.msk.bf16.mxu0 %vm1096_vm2, %v848_v26  ;;  %881 = vmatprep.subr.msk.bf16.mxu1 %vm1096_vm2, %v848_v26 }
  0x36   : > { %853 = vmatpush3.bf16.xpose.msk.msra.mxu0 %vm1096_vm2, %v848_v26  ;;  %889 = vmatpush3.bf16.xpose.msk.msra.mxu1 %vm1096_vm2, %v848_v26 }
  0x37   : > { %856 = vmatprep.subr.msk.bf16.mxu0 %vm1096_vm2, %v854_v31  ;;  %882 = vmatprep.subr.msk.bf16.mxu1 %vm1096_vm2, %v854_v31 }
  0x3e   : > { %859 = vmatpush3.bf16.xpose.msk.msra.mxu0 %vm1096_vm2, %v854_v31  ;;  %890 = vmatpush3.bf16.xpose.msk.msra.mxu1 %vm1096_vm2, %v854_v31 }
  0x3f   : > { %862 = vmatprep.subr.msk.bf16.mxu0 %vm1096_vm2, %v860_v34  ;;  %883 = vmatprep.subr.msk.bf16.mxu1 %vm1096_vm2, %v860_v34 }
  0x46   : > { %865 = vmatpush3.bf16.xpose.msk.msra.mxu0 %vm1096_vm2, %v860_v34  ;;  %891 = vmatpush3.bf16.xpose.msk.msra.mxu1 %vm1096_vm2, %v860_v34 }
  0x47   : > { %868 = vmatprep.subr.msk.bf16.mxu0 %vm1096_vm2, %v866_v37  ;;  %884 = vmatprep.subr.msk.bf16.mxu1 %vm1096_vm2, %v866_v37 }
  0x4e   : > { %871 = vmatpush3.bf16.xpose.msk.msra.mxu0 %vm1096_vm2, %v866_v37  ;;  %892 = vmatpush3.bf16.xpose.msk.msra.mxu1 %vm1096_vm2, %v866_v37 }
  0x4f   : > { %874 = vmatprep.subr.msk.bf16.mxu0 %vm1096_vm2, %v872_v40  ;;  %885 = vmatprep.subr.msk.bf16.mxu1 %vm1096_vm2, %v872_v40 }
  0x56   : > { %877 = vmatpush3.bf16.xpose.msk.msra.mxu0 %vm1096_vm2, %v872_v40  ;;  %893 = vmatpush3.bf16.xpose.msk.msra.mxu1 %vm1096_vm2, %v872_v40 }
  0x5d   : > { %825 = vmatmul.mubr.msk.f32.vlgmr.msra.gmra.mrb[0].mxu0 %vm367_vm1, %v324_v41  ;;  %828 = vmatmul.mubr.msk.f32.vlgmr.msra.gmra.mrb[0].mxu1 %vm367_vm1, %v326_v42 }
  0x9f   : > { %v350_v43 = vpop.permute.xlu0 %349 }
  0xa0   : > { %v360_v44 = vpop.permute.xlu1 %359 }
  0xa3   : > { %v355_v45 = vpop.permute.xlu0 %354 }
  0xa4   : > { %v365_v51 = vpop.permute.xlu1 %364 }
  0xa7   : > { %v524_v55 = vpop.permute.xlu0 %523 }
  0xa8   : > { %v529_v57 = vpop.permute.xlu1 %528 }
  0xab   : > { %v534_v63 = vpop.permute.xlu0 %533 }
  0xac   : > { %v539_v5 = vpop.permute.xlu1 %538 }
 0x130   : > { %v826_v46 = vpop.f32.mrb[0].mxu0  ;;  %v829_v47 = vpop.f32.mrb[0].mxu1 }
 0x131   : > { %v500_v48 = vadd.f32 %v826_v46, %v355_v45  ;;  %v494_v49 = vpop.f32.mrb[1].mxu0  ;;  %v504_v50 = vpop.f32.mrb[1].mxu1  ;;  %v510_v54 = vadd.f32 %v829_v47, %v365_v51 }
 0x132   : > { %v495_v52 = vadd.f32 %v494_v49, %v350_v43  ;;  %v505_v53 = vadd.f32 %v504_v50, %v360_v44 }
 0x133   : > { %936 = vtanh.f32 %v500_v48 }
 0x134   : > { %938 = vtanh.f32 %v495_v52 }
 0x135   : > { %940 = vtanh.f32 %v505_v53 }
 0x136   : > { %942 = vtanh.f32 %v510_v54 }
 0x13d   : > { %v937_v56 = vpop.eup %936 }
 0x13e   : > { %v542_v58 = vmul.f32 %v937_v56, %v529_v57  ;;  %v939_v59 = vpop.eup %938 }
 0x13f   : > { %v941_v60 = vpop.eup %940  ;;  %v541_v61 = vmul.f32 %v939_v59, %v524_v55 }
 0x140   : > { %v943_v62 = vpop.eup %942  ;;  %v543_v4 = vmul.f32 %v941_v60, %v534_v63 }
 0x141   : > { %v545_v3 = vadd.f32 %v542_v58, %v541_v61  ;;  %v544_v6 = vmul.f32 %v943_v62, %v539_v5 }
 0x143   : > { %v546_v7 = vadd.f32 %v545_v3, %v543_v4 }
 0x145   : > { %v547_v9 = vadd.f32 %v546_v7, %v544_v6 }
 0x147   : > { %v548_v10 = vrot.slane %v547_v9, 4 }
 0x149   : > { %v549_v12 = vadd.f32 %v548_v10, %v547_v9 }
 0x14b   : > { %v550_v13 = vrot.slane %v549_v12, 2 }
 0x14d   : > { %v551_v15 = vadd.f32 %v550_v13, %v549_v12 }
 0x14f   : > { %v552_v16 = vrot.slane %v551_v15, 1 }
 0x151   : > { %v553_v18 = vadd.f32 %v552_v16, %v551_v15 }
 0x153   : > { %v556_v19 = vadd.f32 %v555_v17, %v553_v18 }
 0x155   : > { %v557_v22 = vsel %vm311_vm0, %v556_v19, -1e+30 }
 0x156   : > { %559 = vst [vmem:[#allocation6] sm:$0x1] %v557_v22  ;;  %v570_v23 = vsel %vm1247_vm4, %v557_v22, -1e+30 }
 0x157   : > { %v572_v24 = vmax.f32 %v571_v21, %v570_v23 }
 0x159   : > { %v574_v25 = vsub.f32 %v571_v21, %v572_v24  ;;  %v578_v26 = vsub.f32 %v557_v22, %v572_v24  ;;  %584 = vst [vmem:[#allocation2] sm:$0x3] %v572_v24 }
 0x15b   : > { %v575_v27 = vmul.f32 1.442695, %v574_v25  ;;  %v579_v28 = vmul.f32 1.442695, %v578_v26 }
 0x15d   : > { %944 = vpow2.f32 %v575_v27 }
 0x15e   : > { %946 = vpow2.f32 %v579_v28 }
 0x167   : > { %v945_v30 = vpop.eup %944 }
 0x168   : > { %v947_v31 = vpop.eup %946  ;;  %v577_v32 = vmul.f32 %v945_v30, %v573_v29 }
 0x169   : > { %v581_v33 = vsel %vm1247_vm4, %v947_v31, 0.0 }
 0x16a   : > { %v582_v34 = vadd.f32 %v581_v33, %v577_v32 }
 0x16c   : > { %583 = vst [vmem:[#allocation3] sm:$0x3] %v582_v34 }
 0x16d PF: > { %p585_p6 = scmp.eq.s32.totalorder %s999_s23, 1 }
 0x16e   : > { %v590_v35 = vld [vmem:[#allocation2] sm:$0x3] (%p585_p6)  ;;  %vm591_vm5 = vcmask (%p585_p6), 1041408   ;;  %vm603_vm6 = vcmask (%p585_p6), 1024  }
 0x16f   : > { %589 = sbr.rel (!%p585_p6) target bundleno = 682 (0x2aa), region = 56  ;;  %v592_v36 = vsel (%p585_p6), %vm591_vm5, %v590_v35, -inf }
 0x170   : > { %593 = vmax.xlane.f32.xlu0 (%p585_p6), %v592_v36 }
 0x173   : > { %v595_v40 = vld [vmem:[#allocation3] sm:$0x3] (%p585_p6) }
 0x1fd   : > { %v594_v37 = vpop.xlane.xlu0 %593 }
 0x1fe   : > { %v596_v38 = vsub.f32 %v590_v35, %v594_v37  ;;  %604 = vst.msk [vmem:[#allocation4] sm:$0x3] %vm603_vm6, %v594_v37 }
 0x200   : > { %v597_v39 = vmul.f32 1.442695, %v596_v38 }
 0x202   : > { %948 = vpow2.f32 %v597_v39 }
 0x20c   : > { %v949_v41 = vpop.eup %948 }
 0x20d   : > { %v599_v42 = vmul.f32 %v949_v41, %v595_v40 }
 0x20f   : > { %v600_v43 = vsel %vm591_vm5, %v599_v42, 0.0 }
 0x210   : > { %601 = vadd.xlane.f32.xlu0 %v600_v43 }
 0x29d   : > { %v602_v44 = vpop.xlane.xlu0 %601 }
 0x29e   : > { %950 = vrcp.f32 %v602_v44 }
 0x2a8   : > { %v951_v45 = vpop.eup %950 }
 0x2a9   : > { %607 = vst.msk [vmem:[#allocation5] sm:$0x3] %vm603_vm6, %v951_v45 }
 0x2aa PF: > { %p765_p7 = scmp.ne.s32.totalorder %s999_s23, 1 }
 0x2ab   : > { %v613_v46 = vld [vmem:[#allocation4] sm:$0x3] (!%p765_p7)  ;;  %v1012_v47 = vmov (!%p765_p7), 0   ;;  %v622_v49 = vshrl.u32 (!%p765_p7), %v306_v1, 7  ;;  %vm615_vm7 = vcmp.eq.s32.totalorder (!%p765_p7), %v1077_v0, 0 }
 0x2ac   : > { %610 = sbr.rel (%p765_p7) target bundleno = 835 (0x343), region = 60  ;;  %952 = vset.pattern.permute.xlu0 (!%p765_p7), %v1012_v47  ;;  %v612_v52 = vld [vmem:[#allocation6] sm:$0x1] (!%p765_p7) }
 0x2ad   : > { %618 = vperm.xlu0 (!%p765_p7), %952, %v613_v46   ;;  %v623_v50 = vsub.s32 (!%p765_p7), 1, %v622_v49 }
 0x2b0   : > { %v614_v48 = vld [vmem:[#allocation5] sm:$0x3] (!%p765_p7) }
 0x2b1   : > { %629 = vperm.xlu0 (!%p765_p7), %952, %v614_v48  }
 0x32c   : > { %v619_v51 = vpop.permute.xlu0 %618 }
 0x32d   : > { %v624_v53 = vrot.slane %v619_v51, %v623_v50 }
 0x32f   : > { %v626_v54 = vsel %vm615_vm7, %v619_v51, %v624_v53 }
 0x330   : > { %v638_v55 = vsub.f32 %v612_v52, %v626_v54  ;;  %v630_v57 = vpop.permute.xlu0 %629 }
 0x331   : > { %v635_v58 = vrot.slane %v630_v57, %v623_v50 }
 0x332   : > { %v639_v56 = vmul.f32 1.442695, %v638_v55 }
 0x333   : > { %v637_v60 = vsel %vm615_vm7, %v630_v57, %v635_v58 }
 0x334   : > { %953 = vpow2.f32 %v639_v56 }
 0x33e   : > { %v954_v59 = vpop.eup %953 }
 0x33f   : > { %v641_v61 = vmul.f32 %v954_v59, %v637_v60 }
 0x341   : > { %v642_v62 = vsel %vm311_vm0, %v641_v61, 0.0 }
 0x342   : > { %643 = vst [vmem:[#allocation8] sm:$0x1] %v642_v62 }
 0x343 PF: > { %p1265_p8 = scmp.eq.s32.totalorder %s735_s4, 1  ;;  %s1013_s30 = smov [#allocation8]  }
 0x344   : > { %s658_s7 = sshll.u32 %s1013_s30, 4  ;;  %s659_s7 = int_to_ptr.vmem [resolvable:$true] %s658_s7 }
 0x345   : > { %s955_s8 = scalar_lea.vmem %s659_s7, 16  ;;  %s961_s9 = scalar_lea.vmem %s659_s7, 32 }
 0x346   : > { %p956_p9 = scmp.ne.s32.totalorder %s659_s7, %s955_s8  ;;  %p962_p12 = scmp.lt.s32.totalorder %s659_s7, %s659_s7 }
 0x347   : > { %p963_p13 = scmp.lt.s32.totalorder %s961_s9, %s955_s8 }
 0x348   : > { %p957_p10 = pnand %p956_p9, %p1265_p8 }
 0x349   : > { %p964_p0 = por %p963_p13, %p962_p12 }
 0x34a   : > { %p958_p11 = pneg %p957_p10 }
 0x34c   : > { %p965_p1 = pnand %p964_p0, %p958_p11 }
 0x34e   : > { %968 = shalt.err (!%p965_p1)
}
 0x34f   : > { %s969_s11 = scalar_lea.hbm %s1305_s6, 16 }
 0x350   : > { %p970_p2 = scmp.ne.s32.totalorder %s1305_s6, %s969_s11  ;;  %p975_p5 = scmp.lt.u32.totalorder %s969_s11, %s1305_s6 }
 0x352   : > { %p971_p3 = pnand %p970_p2, %p1265_p8 }
 0x354   : > { %p972_p4 = pneg %p971_p3 }
 0x356   : > { %p977_p6 = pnand %p975_p5, %p972_p4 }
 0x358   : > { %980 = shalt.err (!%p977_p6)
}
 0x359   : > { %895 = dma.vmem_to_hbm [thread:$0]  (%p1265_p8), %s659_s7, 16, %s1305_s6, [#allocation9]  }
 0x35a PF: > { %p903_p7 = scmp.ge.s32.totalorder %s1007_s25, 2  ;;  %p904_p9 = scmp.eq.s32.totalorder %s736_s26, 1 }
 0x35c   : > { %p899_p10 = pnand %p904_p9, %p903_p7 }
 0x35e   : > { %994 = dma.done.wait (!%p899_p10), [#allocation9], 16  }
 0x35f   : > { %996 = vsyncadd (!%p899_p10), [#allocation9], 4294967280  ;;  %s20_s25 = sadd.s32 1, %s1007_s25   ;;  %s1311_s23 = smov %s1003_s24 }
 0x360   : > { %p17_p11 = scmp.ge.s32.totalorder %s20_s25, 4   ;;  %s1312_s24 = smov %s1314_s27 }
 0x362   :  { %19 = sbr.rel (!%p17_p11) target bundleno = 5 (0x5), region = 100 }
 0x369   :  { %675 = vsyncpa [#allocation9], 1 }
 0x36a   :  { %677 = vsyncpa [#allocation9 + $0x1], 1 }

</bundles_post_ra>
